<compile_context>
chip_gen: v7x
topology: tpu7x:2x2x1
jax: 0.10.0
libtpu: 0.0.40
codegen_flags: <defaults>
</compile_context>

<pallas_src>
import math
import functools

import jax
import jax.numpy as jnp
from jax import lax
from jax.experimental import pallas as pl
from jax.experimental.pallas import tpu as pltpu

D_MODEL = 16
NUM_HEAD = 4
D_HEAD = D_MODEL // NUM_HEAD
D_FF = 32
EPS = 1e-5

# Column offsets inside the packed weight rows (rows 0..15 of the (24,128) buffer).
_QKV_LO, _QKV_HI = 0, 3 * D_MODEL              # (16, 48)  Wq*scale | Wk | Wv
_WO_LO, _WO_HI = _QKV_HI, _QKV_HI + D_MODEL    # (16, 16)  Wo
_W1_LO, _W1_HI = _WO_HI, _WO_HI + D_FF         # (16, 32)  W1
_W2_LO, _W2_HI = _W1_HI, _W1_HI + D_FF         # (16, 32)  W2^T
assert _W2_HI == 128

_PACKED_ROWS = D_MODEL + 8                     # 16 weight rows + 8 vector rows = 24


def _layernorm(h, gamma, beta):
    # One-pass variance (biased, matches torch.var(unbiased=False)).
    mu = jnp.mean(h, axis=-1, keepdims=True)
    var = jnp.mean(h * h, axis=-1, keepdims=True) - mu * mu
    return gamma * ((h - mu) * lax.rsqrt(var + EPS)) + beta


def encoder_layer_kernel(batch, seq_len, x_ref, p_ref, out_ref):
    D, H, DH = D_MODEL, NUM_HEAD, D_HEAD
    B, S = batch, seq_len
    BS = B * S

    x = x_ref[...].astype(jnp.float32)                       # (BS, D)

    # Single load of the packed parameter block; everything below is value slicing.
    P = p_ref[...]                                            # (24, 128)
    W = P[0:D, :]                                             # (16, 128) weight rows
    g1 = P[D + 0:D + 1, 0:D]
    b1 = P[D + 1:D + 2, 0:D]
    g2 = P[D + 2:D + 3, 0:D]
    b2 = P[D + 3:D + 4, 0:D]
    bqkv = P[D + 4:D + 5, 0:3 * D]
    bo = P[D + 5:D + 6, 0:D]
    bw1 = P[D + 6:D + 7, 0:D_FF]
    bw2 = P[D + 7:D + 8, 0:D]

    # ---- sublayer 1: LayerNorm -> multi-head attention (fused QKV) -> residual ----
    xn = _layernorm(x, g1, b1)                                # (BS, D)

    # 1/sqrt(d_head) already folded into the Q columns / bias at pack time.
    qkv = jnp.dot(xn, W[:, _QKV_LO:_QKV_HI],
                  preferred_element_type=jnp.float32) + bqkv  # (BS, 3D)

    def split_heads(off):
        # Lanes [off + h*DH, off + (h+1)*DH) of row (b*S + s) -> group g = h*B + b.
        return jnp.concatenate(
            [qkv[:, off + h * DH: off + (h + 1) * DH].reshape(B, S, DH)
             for h in range(H)],
            axis=0)                                           # (H*B, S, DH)

    qh = split_heads(0)
    kh = split_heads(D)
    vh = split_heads(2 * D)

    # One batched contraction for all heads & batches: scores[g] = qh[g] @ kh[g]^T
    scores = lax.dot_general(qh, kh, (((2,), (2,)), ((0,), (0,))),
                             preferred_element_type=jnp.float32)   # (H*B, S, S)
    m = jnp.max(scores, axis=-1, keepdims=True)
    e = jnp.exp(scores - m)
    attn = e * pl.reciprocal(jnp.sum(e, axis=-1, keepdims=True))   # exact (EUP idle)
    av = lax.dot_general(attn, vh, (((2,), (1,)), ((0,), (0,))),
                         preferred_element_type=jnp.float32)       # (H*B, S, DH)

    concat = jnp.concatenate(
        [av[h * B:(h + 1) * B].reshape(BS, DH) for h in range(H)],
        axis=-1)                                                   # (BS, D)

    attn_out = jnp.dot(concat, W[:, _WO_LO:_WO_HI],
                       preferred_element_type=jnp.float32) + bo
    x1 = attn_out + x                       # residual (dropout = identity in eval)

    # ---- sublayer 2: LayerNorm -> FFN -> residual ----
    x2n = _layernorm(x1, g2, b2)
    h1 = jnp.maximum(
        jnp.dot(x2n, W[:, _W1_LO:_W1_HI],
                preferred_element_type=jnp.float32) + bw1, 0.0)    # (BS, D_FF)
    # W2 is stored transposed (== W2^T, (D, D_FF)) so the weight rows are exactly 128
    # lanes wide; contract h1's last dim against W2^T's last dim.
    h2 = lax.dot_general(h1, W[:, _W2_LO:_W2_HI],
                         (((1,), (1,)), ((), ())),
                         preferred_element_type=jnp.float32) + bw2  # (BS, D)
    out_ref[...] = (h2 + x1).astype(out_ref.dtype)                  # residual


def pack_params(p):
    """One-time packing of the 16 EncoderLayer parameter arrays into a single
    lane-dense (24, 128) f32 buffer.  Call at init / param-update time — NOT per
    forward pass."""
    f32 = jnp.float32
    scale = 1.0 / math.sqrt(D_HEAD)   # folded into Wq / bq

    wqkv = jnp.concatenate([p["wq"] * scale, p["wk"], p["wv"]], axis=1)   # (D, 3D)
    w_block = jnp.concatenate(
        [wqkv, p["wo"], p["w1"], p["w2"].T], axis=1).astype(f32)          # (16, 128)
    assert w_block.shape == (D_MODEL, 128)

    def row(vec):
        r = jnp.zeros((128,), f32)
        return r.at[: vec.shape[0]].set(vec.astype(f32))

    bqkv = jnp.concatenate([p["bq"] * scale, p["bk"], p["bv"]])           # (3D,)
    v_block = jnp.stack([
        row(p["g1"]), row(p["b1"]), row(p["g2"]), row(p["b2"]),
        row(bqkv), row(p["bo"]), row(p["bw1"]), row(p["bw2"]),
    ])                                                                    # (8, 128)
    packed = jnp.concatenate([w_block, v_block], axis=0)                  # (24, 128)
    assert packed.shape == (_PACKED_ROWS, 128)
    return packed


def encoder_layer(x, packed_params):
    """x: (B, S, D_MODEL) float32; packed_params: (24, 128) f32 from pack_params()."""
    B, S, D = x.shape
    assert D == D_MODEL
    BS = B * S

    x2d = x.reshape(BS, D)      # flatten batch*seq rows (free, outside the kernel)

    kernel = functools.partial(encoder_layer_kernel, B, S)
    out2d = pl.pallas_call(
        kernel,
        out_shape=jax.ShapeDtypeStruct((BS, D), x.dtype),
        grid_spec=pltpu.PrefetchScalarGridSpec(
            num_scalar_prefetch=0,
            grid=(1,),   # single step: whole problem << one grid step of overhead
            in_specs=[
                pl.BlockSpec((BS, D), lambda i: (0, 0)),
                pl.BlockSpec((_PACKED_ROWS, 128), lambda i: (0, 0)),
            ],
            out_specs=pl.BlockSpec((BS, D), lambda i: (0, 0)),
        ),
        compiler_params=pltpu.CompilerParams(
            dimension_semantics=("arbitrary",)),
    )(x2d, packed_params)
    return out2d.reshape(B, S, D)


def init_params(key):
    ks = jax.random.split(key, 8)

    def lin(k, fan_in, fan_out):
        bound = 1.0 / math.sqrt(fan_in)
        kw, kb = jax.random.split(k)
        w = jax.random.uniform(kw, (fan_in, fan_out), jnp.float32, -bound, bound)
        b = jax.random.uniform(kb, (fan_out,), jnp.float32, -bound, bound)
        return w, b

    wq, bq = lin(ks[0], D_MODEL, D_MODEL)
    wk, bk = lin(ks[1], D_MODEL, D_MODEL)
    wv, bv = lin(ks[2], D_MODEL, D_MODEL)
    wo, bo = lin(ks[3], D_MODEL, D_MODEL)
    w1, bw1 = lin(ks[4], D_MODEL, D_FF)
    w2, bw2 = lin(ks[5], D_FF, D_MODEL)
    return dict(
        g1=jnp.ones((D_MODEL,), jnp.float32), b1=jnp.zeros((D_MODEL,), jnp.float32),
        wq=wq, bq=bq, wk=wk, bk=bk, wv=wv, bv=bv, wo=wo, bo=bo,
        g2=jnp.ones((D_MODEL,), jnp.float32), b2=jnp.zeros((D_MODEL,), jnp.float32),
        w1=w1, bw1=bw1, w2=w2, bw2=bw2,
    )


def encoder_layer_ref(x, p):
    """Pure-JAX reference matching the PyTorch forward (eval mode)."""
    def ln(x, g, b):
        m = jnp.mean(x, axis=-1, keepdims=True)
        v = jnp.mean((x - m) ** 2, axis=-1, keepdims=True)
        return g * (x - m) / jnp.sqrt(v + EPS) + b

    B, S, D = x.shape
    xn = ln(x, p["g1"], p["b1"])
    q = xn @ p["wq"] + p["bq"]
    k = xn @ p["wk"] + p["bk"]
    v = xn @ p["wv"] + p["bv"]

    def heads(t):
        return t.reshape(B, S, NUM_HEAD, D_HEAD).transpose(0, 2, 1, 3)

    qh, kh, vh = heads(q), heads(k), heads(v)
    scores = jnp.einsum("bhqd,bhkd->bhqk", qh, kh) / math.sqrt(D_HEAD)
    attn = jax.nn.softmax(scores, axis=-1)
    av = jnp.einsum("bhqk,bhkd->bhqd", attn, vh)
    concat = av.transpose(0, 2, 1, 3).reshape(B, S, D)
    x1 = concat @ p["wo"] + p["bo"] + x
    x2n = ln(x1, p["g2"], p["b2"])
    h = jax.nn.relu(x2n @ p["w1"] + p["bw1"])
    return h @ p["w2"] + p["bw2"] + x1


if __name__ == "__main__":
    key = jax.random.PRNGKey(0)
    k_x, k_p = jax.random.split(key)
    B, S = 2, 8
    x = jax.random.normal(k_x, (B, S, D_MODEL), jnp.float32)
    params = init_params(k_p)

    # One-time packing (hoisted out of the forward path).
    packed = jax.block_until_ready(pack_params(params))

    fwd = jax.jit(encoder_layer)
    out = jax.block_until_ready(fwd(x, packed))

    with jax.default_matmul_precision("highest"):
        ref = jax.block_until_ready(encoder_layer_ref(x, params))

    assert out.shape == (B, S, D_MODEL)
    assert jnp.allclose(out, ref, atol=1e-3, rtol=1e-3), "mismatch vs JAX reference"
    print("KERNEL_OK")
</pallas_src>

<mosaic_0001>
module attributes {stable_mosaic.version = 11 : i64} {
  func.func @encoder_layer_kernel(%arg0: i32, %arg1: memref<16x16xf32, #tpu.memory_space<vmem>>, %arg2: memref<24x128xf32, #tpu.memory_space<vmem>>, %arg3: memref<16x16xf32, #tpu.memory_space<vmem>>) attributes {dimension_semantics = [#tpu.dimension_semantics<arbitrary>], iteration_bounds = array<i64: 1>, scalar_prefetch = 0 : i64, scratch_operands = 0 : i64, tpu.core_type = #tpu.core_type<tc>, window_params = [{pipeline_mode = #tpu.pipeline_mode<synchronous>, transform_indices = @transform_0, window_bounds = array<i64: 16, 16>}, {pipeline_mode = #tpu.pipeline_mode<synchronous>, transform_indices = @transform_1, window_bounds = array<i64: 24, 128>}, {pipeline_mode = #tpu.pipeline_mode<synchronous>, transform_indices = @transform_2, window_bounds = array<i64: 16, 16>}]} {
    %c0 = arith.constant 0 : index
    %c0_0 = arith.constant 0 : index
    %0 = vector.load %arg1[%c0, %c0_0] : memref<16x16xf32, #tpu.memory_space<vmem>>, vector<16x16xf32>
    %c0_1 = arith.constant 0 : index
    %c0_2 = arith.constant 0 : index
    %1 = vector.load %arg2[%c0_1, %c0_2] : memref<24x128xf32, #tpu.memory_space<vmem>>, vector<24x128xf32>
    %2 = vector.extract_strided_slice %1 {offsets = [0, 0], sizes = [16, 128], strides = [1, 1]} : vector<24x128xf32> to vector<16x128xf32>
    %3 = vector.extract_strided_slice %1 {offsets = [16, 0], sizes = [1, 16], strides = [1, 1]} : vector<24x128xf32> to vector<1x16xf32>
    %4 = vector.extract_strided_slice %1 {offsets = [17, 0], sizes = [1, 16], strides = [1, 1]} : vector<24x128xf32> to vector<1x16xf32>
    %5 = vector.extract_strided_slice %1 {offsets = [18, 0], sizes = [1, 16], strides = [1, 1]} : vector<24x128xf32> to vector<1x16xf32>
    %6 = vector.extract_strided_slice %1 {offsets = [19, 0], sizes = [1, 16], strides = [1, 1]} : vector<24x128xf32> to vector<1x16xf32>
    %7 = vector.extract_strided_slice %1 {offsets = [20, 0], sizes = [1, 48], strides = [1, 1]} : vector<24x128xf32> to vector<1x48xf32>
    %8 = vector.extract_strided_slice %1 {offsets = [21, 0], sizes = [1, 16], strides = [1, 1]} : vector<24x128xf32> to vector<1x16xf32>
    %9 = vector.extract_strided_slice %1 {offsets = [22, 0], sizes = [1, 32], strides = [1, 1]} : vector<24x128xf32> to vector<1x32xf32>
    %10 = vector.extract_strided_slice %1 {offsets = [23, 0], sizes = [1, 16], strides = [1, 1]} : vector<24x128xf32> to vector<1x16xf32>
    %cst = arith.constant dense<0.000000e+00> : vector<16xf32>
    %11 = vector.multi_reduction <add>, %0, %cst [1] : vector<16x16xf32> to vector<16xf32>
    %12 = vector.shape_cast %11 : vector<16xf32> to vector<16x1xf32>
    %cst_3 = arith.constant 1.600000e+01 : f32
    %13 = vector.broadcast %cst_3 : f32 to vector<16x1xf32>
    %14 = arith.divf %12, %13 : vector<16x1xf32>
    %15 = arith.mulf %0, %0 : vector<16x16xf32>
    %cst_4 = arith.constant dense<0.000000e+00> : vector<16xf32>
    %16 = vector.multi_reduction <add>, %15, %cst_4 [1] : vector<16x16xf32> to vector<16xf32>
    %17 = vector.shape_cast %16 : vector<16xf32> to vector<16x1xf32>
    %cst_5 = arith.constant 1.600000e+01 : f32
    %18 = vector.broadcast %cst_5 : f32 to vector<16x1xf32>
    %19 = arith.divf %17, %18 : vector<16x1xf32>
    %20 = arith.mulf %14, %14 : vector<16x1xf32>
    %21 = arith.subf %19, %20 : vector<16x1xf32>
    %22 = vector.broadcast %14 : vector<16x1xf32> to vector<16x16xf32>
    %23 = arith.subf %0, %22 : vector<16x16xf32>
    %cst_6 = arith.constant 9.99999974E-6 : f32
    %24 = vector.broadcast %cst_6 : f32 to vector<16x1xf32>
    %25 = arith.addf %21, %24 : vector<16x1xf32>
    %26 = math.rsqrt %25 : vector<16x1xf32>
    %27 = vector.broadcast %26 : vector<16x1xf32> to vector<16x16xf32>
    %28 = arith.mulf %23, %27 : vector<16x16xf32>
    %29 = vector.broadcast %3 : vector<1x16xf32> to vector<16x16xf32>
    %30 = arith.mulf %29, %28 : vector<16x16xf32>
    %31 = vector.broadcast %4 : vector<1x16xf32> to vector<16x16xf32>
    %32 = arith.addf %30, %31 : vector<16x16xf32>
    %33 = vector.extract_strided_slice %2 {offsets = [0, 0], sizes = [16, 48], strides = [1, 1]} : vector<16x128xf32> to vector<16x48xf32>
    %cst_7 = arith.constant dense<0.000000e+00> : vector<16x48xf32>
    %34 = tpu.matmul %32, %33, %cst_7 {dimension_numbers = #tpu.dot_dimension_numbers<[1], [0], [0], [1], [0, 0, 1, 1], [], []>} : vector<16x16xf32>, vector<16x48xf32>, vector<16x48xf32> -> vector<16x48xf32>
    %35 = vector.broadcast %7 : vector<1x48xf32> to vector<16x48xf32>
    %36 = arith.addf %34, %35 : vector<16x48xf32>
    %37 = vector.extract_strided_slice %36 {offsets = [0, 0], sizes = [16, 4], strides = [1, 1]} : vector<16x48xf32> to vector<16x4xf32>
    %38 = vector.shape_cast %37 : vector<16x4xf32> to vector<2x8x4xf32>
    %39 = vector.extract_strided_slice %36 {offsets = [0, 4], sizes = [16, 4], strides = [1, 1]} : vector<16x48xf32> to vector<16x4xf32>
    %40 = vector.shape_cast %39 : vector<16x4xf32> to vector<2x8x4xf32>
    %41 = vector.extract_strided_slice %36 {offsets = [0, 8], sizes = [16, 4], strides = [1, 1]} : vector<16x48xf32> to vector<16x4xf32>
    %42 = vector.shape_cast %41 : vector<16x4xf32> to vector<2x8x4xf32>
    %43 = vector.extract_strided_slice %36 {offsets = [0, 12], sizes = [16, 4], strides = [1, 1]} : vector<16x48xf32> to vector<16x4xf32>
    %44 = vector.shape_cast %43 : vector<16x4xf32> to vector<2x8x4xf32>
    %45 = tpu.concatenate %38, %40, %42, %44 in 0 : vector<2x8x4xf32>, vector<2x8x4xf32>, vector<2x8x4xf32>, vector<2x8x4xf32> -> vector<8x8x4xf32>
    %46 = vector.extract_strided_slice %36 {offsets = [0, 16], sizes = [16, 4], strides = [1, 1]} : vector<16x48xf32> to vector<16x4xf32>
    %47 = vector.shape_cast %46 : vector<16x4xf32> to vector<2x8x4xf32>
    %48 = vector.extract_strided_slice %36 {offsets = [0, 20], sizes = [16, 4], strides = [1, 1]} : vector<16x48xf32> to vector<16x4xf32>
    %49 = vector.shape_cast %48 : vector<16x4xf32> to vector<2x8x4xf32>
    %50 = vector.extract_strided_slice %36 {offsets = [0, 24], sizes = [16, 4], strides = [1, 1]} : vector<16x48xf32> to vector<16x4xf32>
    %51 = vector.shape_cast %50 : vector<16x4xf32> to vector<2x8x4xf32>
    %52 = vector.extract_strided_slice %36 {offsets = [0, 28], sizes = [16, 4], strides = [1, 1]} : vector<16x48xf32> to vector<16x4xf32>
    %53 = vector.shape_cast %52 : vector<16x4xf32> to vector<2x8x4xf32>
    %54 = tpu.concatenate %47, %49, %51, %53 in 0 : vector<2x8x4xf32>, vector<2x8x4xf32>, vector<2x8x4xf32>, vector<2x8x4xf32> -> vector<8x8x4xf32>
    %55 = vector.extract_strided_slice %36 {offsets = [0, 32], sizes = [16, 4], strides = [1, 1]} : vector<16x48xf32> to vector<16x4xf32>
    %56 = vector.shape_cast %55 : vector<16x4xf32> to vector<2x8x4xf32>
    %57 = vector.extract_strided_slice %36 {offsets = [0, 36], sizes = [16, 4], strides = [1, 1]} : vector<16x48xf32> to vector<16x4xf32>
    %58 = vector.shape_cast %57 : vector<16x4xf32> to vector<2x8x4xf32>
    %59 = vector.extract_strided_slice %36 {offsets = [0, 40], sizes = [16, 4], strides = [1, 1]} : vector<16x48xf32> to vector<16x4xf32>
    %60 = vector.shape_cast %59 : vector<16x4xf32> to vector<2x8x4xf32>
    %61 = vector.extract_strided_slice %36 {offsets = [0, 44], sizes = [16, 4], strides = [1, 1]} : vector<16x48xf32> to vector<16x4xf32>
    %62 = vector.shape_cast %61 : vector<16x4xf32> to vector<2x8x4xf32>
    %63 = tpu.concatenate %56, %58, %60, %62 in 0 : vector<2x8x4xf32>, vector<2x8x4xf32>, vector<2x8x4xf32>, vector<2x8x4xf32> -> vector<8x8x4xf32>
    %cst_8 = arith.constant dense<0.000000e+00> : vector<8x8x8xf32>
    %64 = tpu.matmul %45, %54, %cst_8 {dimension_numbers = #tpu.dot_dimension_numbers<[2], [2], [1], [1], [0, 0, 0, 1, 1, 1], [0], [0]>} : vector<8x8x4xf32>, vector<8x8x4xf32>, vector<8x8x8xf32> -> vector<8x8x8xf32>
    %cst_9 = arith.constant dense<0xFF800000> : vector<8x8xf32>
    %65 = vector.multi_reduction <maximumf>, %64, %cst_9 [2] : vector<8x8x8xf32> to vector<8x8xf32>
    %66 = vector.shape_cast %65 : vector<8x8xf32> to vector<8x8x1xf32>
    %67 = vector.broadcast %66 : vector<8x8x1xf32> to vector<8x8x8xf32>
    %68 = arith.subf %64, %67 : vector<8x8x8xf32>
    %69 = math.exp %68 : vector<8x8x8xf32>
    %cst_10 = arith.constant dense<0.000000e+00> : vector<8x8xf32>
    %70 = vector.multi_reduction <add>, %69, %cst_10 [2] : vector<8x8x8xf32> to vector<8x8xf32>
    %71 = vector.shape_cast %70 : vector<8x8xf32> to vector<8x8x1xf32>
    %72 = tpu.reciprocal %71 : vector<8x8x1xf32> -> vector<8x8x1xf32>
    %73 = vector.broadcast %72 : vector<8x8x1xf32> to vector<8x8x8xf32>
    %74 = arith.mulf %69, %73 : vector<8x8x8xf32>
    %cst_11 = arith.constant dense<0.000000e+00> : vector<8x8x4xf32>
    %75 = tpu.matmul %74, %63, %cst_11 {dimension_numbers = #tpu.dot_dimension_numbers<[2], [1], [1], [2], [0, 0, 0, 1, 1, 2], [0], [0]>} : vector<8x8x8xf32>, vector<8x8x4xf32>, vector<8x8x4xf32> -> vector<8x8x4xf32>
    %76 = vector.extract_strided_slice %75 {offsets = [0, 0, 0], sizes = [2, 8, 4], strides = [1, 1, 1]} : vector<8x8x4xf32> to vector<2x8x4xf32>
    %77 = vector.shape_cast %76 : vector<2x8x4xf32> to vector<16x4xf32>
    %78 = vector.extract_strided_slice %75 {offsets = [2, 0, 0], sizes = [2, 8, 4], strides = [1, 1, 1]} : vector<8x8x4xf32> to vector<2x8x4xf32>
    %79 = vector.shape_cast %78 : vector<2x8x4xf32> to vector<16x4xf32>
    %80 = vector.extract_strided_slice %75 {offsets = [4, 0, 0], sizes = [2, 8, 4], strides = [1, 1, 1]} : vector<8x8x4xf32> to vector<2x8x4xf32>
    %81 = vector.shape_cast %80 : vector<2x8x4xf32> to vector<16x4xf32>
    %82 = vector.extract_strided_slice %75 {offsets = [6, 0, 0], sizes = [2, 8, 4], strides = [1, 1, 1]} : vector<8x8x4xf32> to vector<2x8x4xf32>
    %83 = vector.shape_cast %82 : vector<2x8x4xf32> to vector<16x4xf32>
    %84 = tpu.concatenate %77, %79, %81, %83 in 1 : vector<16x4xf32>, vector<16x4xf32>, vector<16x4xf32>, vector<16x4xf32> -> vector<16x16xf32>
    %85 = vector.extract_strided_slice %2 {offsets = [0, 48], sizes = [16, 16], strides = [1, 1]} : vector<16x128xf32> to vector<16x16xf32>
    %cst_12 = arith.constant dense<0.000000e+00> : vector<16x16xf32>
    %86 = tpu.matmul %84, %85, %cst_12 {dimension_numbers = #tpu.dot_dimension_numbers<[1], [0], [0], [1], [0, 0, 1, 1], [], []>} : vector<16x16xf32>, vector<16x16xf32>, vector<16x16xf32> -> vector<16x16xf32>
    %87 = vector.broadcast %8 : vector<1x16xf32> to vector<16x16xf32>
    %88 = arith.addf %86, %87 : vector<16x16xf32>
    %89 = arith.addf %88, %0 : vector<16x16xf32>
    %cst_13 = arith.constant dense<0.000000e+00> : vector<16xf32>
    %90 = vector.multi_reduction <add>, %89, %cst_13 [1] : vector<16x16xf32> to vector<16xf32>
    %91 = vector.shape_cast %90 : vector<16xf32> to vector<16x1xf32>
    %cst_14 = arith.constant 1.600000e+01 : f32
    %92 = vector.broadcast %cst_14 : f32 to vector<16x1xf32>
    %93 = arith.divf %91, %92 : vector<16x1xf32>
    %94 = arith.mulf %89, %89 : vector<16x16xf32>
    %cst_15 = arith.constant dense<0.000000e+00> : vector<16xf32>
    %95 = vector.multi_reduction <add>, %94, %cst_15 [1] : vector<16x16xf32> to vector<16xf32>
    %96 = vector.shape_cast %95 : vector<16xf32> to vector<16x1xf32>
    %cst_16 = arith.constant 1.600000e+01 : f32
    %97 = vector.broadcast %cst_16 : f32 to vector<16x1xf32>
    %98 = arith.divf %96, %97 : vector<16x1xf32>
    %99 = arith.mulf %93, %93 : vector<16x1xf32>
    %100 = arith.subf %98, %99 : vector<16x1xf32>
    %101 = vector.broadcast %93 : vector<16x1xf32> to vector<16x16xf32>
    %102 = arith.subf %89, %101 : vector<16x16xf32>
    %cst_17 = arith.constant 9.99999974E-6 : f32
    %103 = vector.broadcast %cst_17 : f32 to vector<16x1xf32>
    %104 = arith.addf %100, %103 : vector<16x1xf32>
    %105 = math.rsqrt %104 : vector<16x1xf32>
    %106 = vector.broadcast %105 : vector<16x1xf32> to vector<16x16xf32>
    %107 = arith.mulf %102, %106 : vector<16x16xf32>
    %108 = vector.broadcast %5 : vector<1x16xf32> to vector<16x16xf32>
    %109 = arith.mulf %108, %107 : vector<16x16xf32>
    %110 = vector.broadcast %6 : vector<1x16xf32> to vector<16x16xf32>
    %111 = arith.addf %109, %110 : vector<16x16xf32>
    %112 = vector.extract_strided_slice %2 {offsets = [0, 64], sizes = [16, 32], strides = [1, 1]} : vector<16x128xf32> to vector<16x32xf32>
    %cst_18 = arith.constant dense<0.000000e+00> : vector<16x32xf32>
    %113 = tpu.matmul %111, %112, %cst_18 {dimension_numbers = #tpu.dot_dimension_numbers<[1], [0], [0], [1], [0, 0, 1, 1], [], []>} : vector<16x16xf32>, vector<16x32xf32>, vector<16x32xf32> -> vector<16x32xf32>
    %114 = vector.broadcast %9 : vector<1x32xf32> to vector<16x32xf32>
    %115 = arith.addf %113, %114 : vector<16x32xf32>
    %cst_19 = arith.constant 0.000000e+00 : f32
    %116 = vector.broadcast %cst_19 : f32 to vector<16x32xf32>
    %117 = arith.maximumf %115, %116 : vector<16x32xf32>
    %118 = vector.extract_strided_slice %2 {offsets = [0, 96], sizes = [16, 32], strides = [1, 1]} : vector<16x128xf32> to vector<16x32xf32>
    %cst_20 = arith.constant dense<0.000000e+00> : vector<16x16xf32>
    %119 = tpu.matmul %117, %118, %cst_20 {dimension_numbers = #tpu.dot_dimension_numbers<[1], [1], [0], [0], [0, 0, 1, 0], [], []>} : vector<16x32xf32>, vector<16x32xf32>, vector<16x16xf32> -> vector<16x16xf32>
    %120 = vector.broadcast %10 : vector<1x16xf32> to vector<16x16xf32>
    %121 = arith.addf %119, %120 : vector<16x16xf32>
    %122 = arith.addf %121, %89 : vector<16x16xf32>
    %c0_21 = arith.constant 0 : index
    %c0_22 = arith.constant 0 : index
    %123 = vector.load %arg3[%c0_21, %c0_22] : memref<16x16xf32, #tpu.memory_space<vmem>>, vector<16x16xf32>
    tpu.vector_store %arg3[%c0_21, %c0_22], %122 {strides = array<i32>} : memref<16x16xf32, #tpu.memory_space<vmem>>, vector<16x16xf32>,
    return
  }
  func.func @transform_0(%arg0: i32) -> (i32, i32) {
    %c0_i32 = arith.constant 0 : i32
    %c0_i32_0 = arith.constant 0 : i32
    %c0_i32_1 = arith.constant 0 : i32
    return %c0_i32, %c0_i32_0 : i32, i32
  }
  func.func @transform_1(%arg0: i32) -> (i32, i32) {
    %c0_i32 = arith.constant 0 : i32
    %c0_i32_0 = arith.constant 0 : i32
    %c0_i32_1 = arith.constant 0 : i32
    return %c0_i32, %c0_i32_0 : i32, i32
  }
  func.func @transform_2(%arg0: i32) -> (i32, i32) {
    %c0_i32 = arith.constant 0 : i32
    %c0_i32_0 = arith.constant 0 : i32
    %c0_i32_1 = arith.constant 0 : i32
    return %c0_i32, %c0_i32_0 : i32, i32
  }
}

</mosaic_0001>

<bundles_post_ra>
// kernel: encoder_layer.1
= control target key start
LH: loop header
LB: loop body
LE: loop exit
PB: predicated region body
PF: predicated region fallthrough
CT: control target
= control target key end

     0   :  { %7 = vsyncpa [#allocation3], 0  ;;  %s2549_s0 = inlined_call_operand.hbm [shape: f32[16,16], index: 0, kind: input, shape index: {}]   ;;  %s2550_s1 = inlined_call_operand.hbm [shape: f32[24,128], index: 1, kind: input, shape index: {}]   ;;  %s2551_s2 = inlined_call_operand.hbm [shape: f32[16,16], index: 2, kind: output, shape index: {}]  }
   0x1   :  { %8 = vsyncpa [#allocation6], 0 }
   0x2   :  { %9 = vsyncpa [#allocation4], 0  ;;  %s2223_s9 = smov [#allocation2]   ;;  %s2151_s13 = scalar_lea.hbm %s2549_s0, 256 }
   0x3   :  { %s15_s10 = sshll.u32 %s2223_s9, 4  ;;  %p2152_p0 = scmp.ne.s32.totalorder %s2549_s0, %s2151_s13  ;;  %s16_s10 = int_to_ptr.vmem [resolvable:$true] %s15_s10 }
   0x4   :  { %p2155_p1 = scmp.lt.u32.totalorder %s2151_s13, %s2549_s0 }
   0x6   :  { %p2157_p2 = pnand %p2155_p1, %p2152_p0 }
   0x8   :  { %2160 = shalt.err (!%p2157_p2)
}
   0x9   :  { %s2161_s18 = scalar_lea.vmem %s16_s10, 256  ;;  %p2166_p4 = scmp.lt.s32.totalorder %s16_s10, %s16_s10 }
   0xa   :  { %p2162_p3 = scmp.ne.s32.totalorder %s16_s10, %s2161_s18  ;;  %p2167_p5 = scmp.lt.s32.totalorder %s2161_s18, %s2161_s18 }
   0xc   :  { %p2168_p6 = por %p2167_p5, %p2166_p4 }
   0xe   :  { %p2169_p7 = pnand %p2168_p6, %p2162_p3 }
  0x10   :  { %2172 = shalt.err (!%p2169_p7)
}
  0x11   :  { %s2224_s19 = smov 128   ;;  %s2225_s20 = smov 8  }
  0x12   :  { %21 = dma.hbm_to_vmem [thread:$0]  %s2549_s0, 256, %s16_s10, [#allocation3], %s2224_s19, %s2224_s19, %s2225_s20  }
  0x13   :  { %s2226_s23 = smov [#allocation5]   ;;  %s2173_s27 = scalar_lea.hbm %s2550_s1, 384 }
  0x14   :  { %s27_s24 = sshll.u32 %s2226_s23, 4  ;;  %p2174_p8 = scmp.ne.s32.totalorder %s2550_s1, %s2173_s27  ;;  %s28_s24 = int_to_ptr.vmem [resolvable:$true] %s27_s24 }
  0x15   :  { %p2177_p9 = scmp.lt.u32.totalorder %s2173_s27, %s2550_s1 }
  0x17   :  { %p2179_p10 = pnand %p2177_p9, %p2174_p8 }
  0x19   :  { %2182 = shalt.err (!%p2179_p10)
}
  0x1a   :  { %s2183_s4 = scalar_lea.vmem %s28_s24, 384  ;;  %p2188_p12 = scmp.lt.s32.totalorder %s28_s24, %s28_s24 }
  0x1b   :  { %p2184_p11 = scmp.ne.s32.totalorder %s28_s24, %s2183_s4  ;;  %p2189_p13 = scmp.lt.s32.totalorder %s2183_s4, %s2183_s4 }
  0x1d   :  { %p2190_p0 = por %p2189_p13, %p2188_p12 }
  0x1f   :  { %p2191_p1 = pnand %p2190_p0, %p2184_p11 }
  0x21   :  { %2194 = shalt.err (!%p2191_p1)
}
  0x22   :  { %33 = dma.hbm_to_vmem [thread:$0]  %s2550_s1, 384, %s28_s24, [#allocation6], %s2224_s19, %s2224_s19, %s2225_s20  }
  0x23   :  { %2217 = dma.done.wait [#allocation3], 256  }
  0x24   :  { %2218 = vsyncadd [#allocation3], 4294967040 }
  0x25   :  { %2219 = dma.done.wait [#allocation6], 384  }
  0x26   :  { %2220 = vsyncadd [#allocation6], 4294966912  ;;  %vm45_vm0 = vcmask 130048   ;;  %v2285_v0 = vld [vmem:[#allocation2] sm:$0xff]  ;;  %v2287_v1 = vld [vmem:[#allocation2 + $0x8] sm:$0xff]  ;;  %v77_v20 = vlaneseq  ;;  %v2227_v44 = vmov 0.0  }
  0x27   :  { %v46_v2 = vsel %vm45_vm0, %v2285_v0, 0.0  ;;  %v55_v3 = vmul.f32 %v2285_v0, %v2285_v0  ;;  %v56_v4 = vmul.f32 %v2287_v1, %v2287_v1  ;;  %v49_v6 = vsel %vm45_vm0, %v2287_v1, 0.0  ;;  %v2299_v8 = vld [vmem:[#allocation5] sm:$0xff]  ;;  %v2301_v9 = vld [vmem:[#allocation5 + $0x8] sm:$0xff]  ;;  %v2308_v28 = vld [vmem:[#allocation5 + $0x10] sm:$0xff]  ;;  %1960 = vmatprep.subr.mxu1 %v2227_v44  ;;  %s2229_s1 = smov 124  }
  0x28   :  { %47 = vadd.xlane.f32.xlu0 %v46_v2  ;;  %v2061_v10 = vpack.c.bf16 %v2301_v9, %v2299_v8  ;;  %v2305_v25 = vshrl.u32 %v77_v20, 7  ;;  %vm2228_vm1 = vmmov 0   ;;  %s2230_s6 = smov 120   ;;  %s2231_s7 = smov 116   ;;  %vm190_vm2 = vcmask 31744  }
  0x29   :  { %v57_v5 = vsel %vm45_vm0, %v55_v3, 0.0  ;;  %v60_v7 = vsel %vm45_vm0, %v56_v4, 0.0  ;;  %1962 = vmatprep.mubr.msk.f32.mxu1 %vm2228_vm1, %v2227_v44  ;;  %s2232_s8 = smov 112   ;;  %vm797_vm3 = vcmask 64512   ;;  %s2233_s9 = smov 96   ;;  %vm1522_vm4 = vcmask 97280  }
  0x2a   :  { %58 = vadd.xlane.f32.xlu1 %v57_v5  ;;  %2062 = vmatprep.subr.bf16.mxu0 %v2061_v10  ;;  %v79_v27 = vsub.s32 0, %v2305_v25  ;;  %v85_v29 = vsub.s32 1, %v2305_v25  ;;  %v91_v42 = vsub.s32 4, %v2305_v25  ;;  %s2234_s10 = smov 80   ;;  %s2235_s11 = smov 4   ;;  %vm1763_vm5 = vcmask 261120  }
  0x2b   :  { %2064 = vmatpush3.bf16.msra.mxu0 %v2061_v10  ;;  %s2236_s12 = smov 12   ;;  %s2237_s13 = smov 64   ;;  %vm2074_vm6 = vmpackc.low %vm1763_vm5, %vm1763_vm5 }
  0x2c   :  { %50 = vadd.xlane.f32.xlu0 %v49_v6  ;;  %v80_v31 = vrot.slane %v2308_v28, %v79_v27  ;;  %v86_v34 = vrot.slane %v2308_v28, %v85_v29  ;;  %v92_v43 = vrot.slane %v2308_v28, %v91_v42  ;;  %1965 = vmatprep.subr.mxu0 %v2227_v44  ;;  %s2238_s14 = smov 32   ;;  %s2239_s15 = smov [#allocation7]  }
  0x2d   :  { %s1858_s16 = sshll.u32 %s2239_s15, 4  ;;  %s1859_s16 = int_to_ptr.vmem [resolvable:$true] %s1858_s16 }
  0x2e   :  { %61 = vadd.xlane.f32.xlu1 %v60_v7  ;;  %s2195_s17 = scalar_lea.vmem %s1859_s16, 256  ;;  %p2200_p3 = scmp.lt.s32.totalorder %s1859_s16, %s1859_s16 }
  0x2f   :  { %p2196_p2 = scmp.ne.s32.totalorder %s1859_s16, %s2195_s17  ;;  %p2201_p4 = scmp.lt.s32.totalorder %s2195_s17, %s2195_s17 }
  0x31   :  { %p2202_p5 = por %p2201_p4, %p2200_p3 }
  0x33   :  { %p2203_p6 = pnand %p2202_p5, %p2196_p2 }
  0xb5   :  { %v48_v11 = vpop.xlane.xlu0 %47 }
  0xb6   :  { %v53_v12 = vmul.f32 0.0625, %v48_v11 }
  0xb7   :  { %v59_v13 = vpop.xlane.xlu1 %58 }
  0xb8   :  { %v65_v14 = vmul.f32 %v53_v12, %v53_v12  ;;  %v63_v15 = vmul.f32 0.0625, %v59_v13  ;;  %v69_v30 = vsub.f32 %v2285_v0, %v53_v12 }
  0xb9   :  { %v51_v16 = vpop.xlane.xlu0 %50 }
  0xba   :  { %v67_v17 = vsub.f32 %v63_v15, %v65_v14  ;;  %v54_v18 = vmul.f32 0.0625, %v51_v16 }
  0xbb   :  { %v62_v19 = vpop.xlane.xlu1 %61 }
  0xbc   :  { %v71_v21 = vadd.f32 1e-05, %v67_v17  ;;  %v66_v22 = vmul.f32 %v54_v18, %v54_v18  ;;  %v64_v23 = vmul.f32 0.0625, %v62_v19  ;;  %v70_v35 = vsub.f32 %v2287_v1, %v54_v18 }
  0xbe   :  { %2111 = vrsqrt.f32 %v71_v21  ;;  %v68_v24 = vsub.f32 %v64_v23, %v66_v22 }
  0xc0   :  { %v72_v26 = vadd.f32 1e-05, %v68_v24 }
  0xc2   :  { %2113 = vrsqrt.f32 %v72_v26 }
  0xc8   :  { %v2112_v32 = vpop.eup %2111 }
  0xc9   :  { %v75_v33 = vmul.f32 %v2112_v32, %v69_v30 }
  0xcb   :  { %v81_v36 = vmul.f32 %v80_v31, %v75_v33 }
  0xcc   :  { %v2114_v37 = vpop.eup %2113 }
  0xcd   :  { %v76_v38 = vmul.f32 %v2114_v37, %v70_v35  ;;  %v87_v39 = vadd.f32 %v86_v34, %v81_v36 }
  0xcf   :  { %v82_v40 = vmul.f32 %v80_v31, %v76_v38  ;;  %1957 = vmatprep.mubr.msk.f32.mxu0 %vm45_vm0, %v87_v39 }
  0xd1   :  { %v88_v41 = vadd.f32 %v86_v34, %v82_v40 }
  0xd3   :  { %1958 = vmatmul.mubr.msk.f32.vlgmr.msra.gmra.mrb[0].mxu0 %vm45_vm0, %v88_v41 }
  0xd4   :  { %1967 = vmatprep.mubr.msk.f32.mxu0 %vm2228_vm1, %v2227_v44 }
 0x1a6   :  { %v1959_v45 = vpop.f32.mrb[0].mxu0 }
 0x1a7   :  { %v2325_v46 = vadd.f32 %v1959_v45, %v92_v43  ;;  %v165_v47 = vpop.f32.mrb[1].mxu0 }
 0x1a8   :  { %v2327_v48 = vadd.f32 %v165_v47, %v92_v43 }
 0x1a9   :  { %178 = vrot.lane.b32.xlu1 %v2325_v46, %s2229_s1 }
 0x1aa   :  { %176 = vrot.lane.b32.xlu0 %v2327_v48, %s2229_s1 }
 0x1ad   :  { %180 = vrot.lane.b32.xlu1 %v2327_v48, %s2230_s6 }
 0x1ae   :  { %184 = vrot.lane.b32.xlu0 %v2327_v48, %s2231_s7 }
 0x1b1   :  { %182 = vrot.lane.b32.xlu1 %v2325_v46, %s2230_s6 }
 0x1b2   :  { %188 = vrot.lane.b32.xlu0 %v2327_v48, %s2232_s8 }
 0x1b5   :  { %186 = vrot.lane.b32.xlu1 %v2325_v46, %s2231_s7 }
 0x1b9   :  { %265 = vrot.lane.b32.xlu1 %v2325_v46, %s2232_s8 }
 0x21b   :  { %v2337_v49 = vpop.permute.xlu1 %178 }
 0x21c   :  { %417 = vrot.lane.b32.xlu1 %v2337_v49, %s2232_s8  ;;  %v2340_v50 = vpop.permute.xlu0 %176 }
 0x21d   :  { %341 = vrot.lane.b32.xlu0 %v2340_v50, %s2232_s8 }
 0x21f   :  { %v2343_v51 = vpop.permute.xlu1 %180 }
 0x220   :  { %v2345_v52 = vpop.permute.xlu0 %184 }
 0x221   :  { %493 = vrot.lane.b32.xlu0 %v2343_v51, %s2232_s8 }
 0x223   :  { %v2348_v53 = vpop.permute.xlu1 %182 }
 0x224   :  { %569 = vrot.lane.b32.xlu1 %v2348_v53, %s2232_s8  ;;  %v189_v54 = vpop.permute.xlu0 %188 }
 0x225   :  { %645 = vrot.lane.b32.xlu0 %v2345_v52, %s2232_s8  ;;  %1961 = vmatpush3.xpose.msk.msra.mxu1 %vm190_vm2, %v189_v54 }
 0x226   :  { %1970 = vmatprep.subr.mxu1 %v2227_v44 }
 0x227   :  { %v2354_v55 = vpop.permute.xlu1 %186 }
 0x228   :  { %721 = vrot.lane.b32.xlu1 %v2354_v55, %s2232_s8  ;;  %1963 = vmatmul.mubr.msk.f32.vlgmr.msra.gmra.mrb[0].mxu1 %vm190_vm2, %v2327_v48 }
 0x229   :  { %1972 = vmatprep.mubr.msk.f32.mxu1 %vm2228_vm1, %v2227_v44 }
 0x22b   :  { %v266_v56 = vpop.permute.xlu1 %265 }
 0x22c   :  { %1966 = vmatpush3.xpose.msk.msra.mxu0 %vm190_vm2, %v266_v56 }
 0x22d   :  { %1975 = vmatprep.subr.mxu0 %v2227_v44 }
 0x22f   :  { %1968 = vmatmul.mubr.msk.f32.vlgmr.msra.gmra.mrb[2].mxu0 %vm190_vm2, %v2325_v46 }
 0x230   :  { %1977 = vmatprep.mubr.msk.f32.mxu0 %vm2228_vm1, %v2227_v44 }
 0x28e   :  { %v418_v57 = vpop.permute.xlu1 %417 }
 0x28f   :  { %1976 = vmatpush3.xpose.msk.msra.mxu0 %vm190_vm2, %v418_v57  ;;  %v342_v58 = vpop.permute.xlu0 %341 }
 0x290   :  { %1971 = vmatpush3.xpose.msk.msra.mxu1 %vm190_vm2, %v342_v58  ;;  %1985 = vmatprep.subr.mxu0 %v2227_v44 }
 0x291   :  { %1980 = vmatprep.subr.mxu1 %v2227_v44 }
 0x292   :  { %1978 = vmatmul.mubr.msk.f32.vlgmr.msra.gmra.mrb[4].mxu0 %vm190_vm2, %v2337_v49 }
 0x293   :  { %1973 = vmatmul.mubr.msk.f32.vlgmr.msra.gmra.mrb[2].mxu1 %vm190_vm2, %v2340_v50  ;;  %v494_v59 = vpop.permute.xlu0 %493  ;;  %1987 = vmatprep.mubr.msk.f32.mxu0 %vm2228_vm1, %v2227_v44 }
 0x294   :  { %1981 = vmatpush3.xpose.msk.msra.mxu1 %vm190_vm2, %v494_v59  ;;  %1982 = vmatprep.mubr.msk.f32.mxu1 %vm2228_vm1, %v2227_v44 }
 0x295   :  { %1990 = vmatprep.subr.mxu1 %v2227_v44 }
 0x296   :  { %v570_v60 = vpop.permute.xlu1 %569 }
 0x297   :  { %1983 = vmatmul.mubr.msk.f32.vlgmr.msra.gmra.mrb[4].mxu1 %vm190_vm2, %v2343_v51  ;;  %1986 = vmatpush3.xpose.msk.msra.mxu0 %vm190_vm2, %v570_v60  ;;  %v646_v61 = vpop.permute.xlu0 %645 }
 0x298   :  { %1991 = vmatpush3.xpose.msk.msra.mxu1 %vm190_vm2, %v646_v61  ;;  %1995 = vmatprep.subr.mxu0 %v2227_v44 }
 0x299   :  { %1992 = vmatprep.mubr.msk.f32.mxu1 %vm2228_vm1, %v2227_v44  ;;  %2000 = vmatprep.subr.mxu1 %v2227_v44 }
 0x29a   :  { %1988 = vmatmul.mubr.msk.f32.vlgmr.msra.gmra.mrb[6].mxu0 %vm190_vm2, %v2348_v53  ;;  %v722_v62 = vpop.permute.xlu1 %721 }
 0x29b   :  { %1993 = vmatmul.mubr.msk.f32.vlgmr.msra.gmra.mrb[6].mxu1 %vm190_vm2, %v2345_v52  ;;  %1996 = vmatpush3.xpose.msk.msra.mxu0 %vm190_vm2, %v722_v62 }
 0x29c   :  { %1997 = vmatprep.mubr.msk.f32.mxu0 %vm2228_vm1, %v2227_v44  ;;  %2005 = vmatprep.subr.mxu0 %v2227_v44 }
 0x29d   :  { %2002 = vmatprep.mubr.msk.f32.mxu1 %vm2228_vm1, %v2227_v44 }
 0x29e   :  { %1998 = vmatmul.mubr.msk.f32.vlgmr.msra.gmra.mrb[8].mxu0 %vm190_vm2, %v2354_v55 }
 0x29f   :  { %2007 = vmatprep.mubr.msk.f32.mxu0 %vm2228_vm1, %v2227_v44 }
 0x2fb   :  { %v261_v63 = vpop.f32.mrb[0].mxu1 }
 0x2fc   :  { %v1964_v2 = vpop.f32.mrb[1].mxu1  ;;  %v798_v3 = vsel %vm797_vm3, %v261_v63, -inf }
 0x2fd   :  { %799 = vmax.xlane.f32.xlu0 %v798_v3 }
 0x302   :  { %v337_v4 = vpop.f32.mrb[2].mxu0 }
 0x303   :  { %v1969_v5 = vpop.f32.mrb[3].mxu0  ;;  %v801_v6 = vsel %vm797_vm3, %v337_v4, -inf }
 0x304   :  { %802 = vmax.xlane.f32.xlu1 %v801_v6 }
 0x365   :  { %v489_v7 = vpop.f32.mrb[4].mxu0 }
 0x366   :  { %v413_v10 = vpop.f32.mrb[2].mxu1  ;;  %v1979_v11 = vpop.f32.mrb[5].mxu0  ;;  %v807_v12 = vsel %vm797_vm3, %v489_v7, -inf }
 0x367   :  { %808 = vmax.xlane.f32.xlu0 %v807_v12  ;;  %v1974_v13 = vpop.f32.mrb[3].mxu1  ;;  %v804_v15 = vsel %vm797_vm3, %v413_v10, -inf }
 0x36a   :  { %v565_v14 = vpop.f32.mrb[4].mxu1 }
 0x36b   :  { %805 = vmax.xlane.f32.xlu0 %v804_v15  ;;  %v1984_v16 = vpop.f32.mrb[5].mxu1  ;;  %v810_v21 = vsel %vm797_vm3, %v565_v14, -inf }
 0x36d   :  { %v641_v17 = vpop.f32.mrb[6].mxu0 }
 0x36e   :  { %v1989_v18 = vpop.f32.mrb[7].mxu0  ;;  %v717_v19 = vpop.f32.mrb[6].mxu1  ;;  %v813_v20 = vsel %vm797_vm3, %v641_v17, -inf }
 0x36f   :  { %814 = vmax.xlane.f32.xlu1 %v813_v20  ;;  %811 = vmax.xlane.f32.xlu0 %v810_v21  ;;  %v1994_v22 = vpop.f32.mrb[7].mxu1  ;;  %v816_v27 = vsel %vm797_vm3, %v717_v19, -inf }
 0x371   :  { %v793_v23 = vpop.f32.mrb[8].mxu0 }
 0x372   :  { %v1999_v24 = vpop.f32.mrb[9].mxu0  ;;  %v819_v26 = vsel %vm797_vm3, %v793_v23, -inf }
 0x373   :  { %820 = vmax.xlane.f32.xlu1 %v819_v26  ;;  %817 = vmax.xlane.f32.xlu0 %v816_v27 }
 0x384   :  { %962 = vrot.lane.b32.xlu1 %v2325_v46, %s2233_s9 }
 0x388   :  { %1038 = vrot.lane.b32.xlu1 %v2340_v50, %s2233_s9 }
 0x389   :  { %886 = vrot.lane.b32.xlu0 %v2327_v48, %s2233_s9 }
 0x38a   :  { %v800_v29 = vpop.xlane.xlu0 %799 }
 0x38b   :  { %v822_v30 = vsub.f32 %v261_v63, %v800_v29 }
 0x38c   :  { %1114 = vrot.lane.b32.xlu1 %v2337_v49, %s2233_s9 }
 0x38d   :  { %1190 = vrot.lane.b32.xlu0 %v2343_v51, %s2233_s9  ;;  %v830_v31 = vmul.f32 1.442695, %v822_v30 }
 0x38f   :  { %2115 = vpow2.f32 %v830_v31 }
 0x390   :  { %1266 = vrot.lane.b32.xlu1 %v2348_v53, %s2233_s9 }
 0x391   :  { %v803_v32 = vpop.xlane.xlu1 %802 }
 0x392   :  { %v823_v33 = vsub.f32 %v337_v4, %v803_v32 }
 0x394   :  { %v832_v34 = vmul.f32 1.442695, %v823_v33 }
 0x396   :  { %2117 = vpow2.f32 %v832_v34  ;;  %v2468_v34 = vpack.i.bf16 %v2301_v9, %v2299_v8 }
 0x399   :  { %v2423_v35 = vpop.eup %2115 }
 0x39a   :  { %v846_v36 = vsel %vm797_vm3, %v2423_v35, 0.0 }
 0x3a0   :  { %v2427_v37 = vpop.eup %2117 }
 0x3a1   :  { %v849_v38 = vsel %vm797_vm3, %v2427_v37, 0.0 }
 0x3ac   :  { %847 = vadd.xlane.f32.xlu0 %v846_v36 }
 0x3b4   :  { %850 = vadd.xlane.f32.xlu1 %v849_v38 }
 0x3f4   :  { %v809_v39 = vpop.xlane.xlu0 %808 }
 0x3f5   :  { %v825_v40 = vsub.f32 %v489_v7, %v809_v39 }
 0x3f7   :  { %v836_v41 = vmul.f32 1.442695, %v825_v40 }
 0x3f8   :  { %v806_v42 = vpop.xlane.xlu0 %805 }
 0x3f9   :  { %2119 = vpow2.f32 %v836_v41  ;;  %v824_v43 = vsub.f32 %v413_v10, %v806_v42 }
 0x3fb   :  { %v834_v45 = vmul.f32 1.442695, %v824_v43 }
 0x3fc   :  { %v815_v46 = vpop.xlane.xlu1 %814  ;;  %v812_v47 = vpop.xlane.xlu0 %811 }
 0x3fd   :  { %2121 = vpow2.f32 %v834_v45  ;;  %v827_v48 = vsub.f32 %v641_v17, %v815_v46  ;;  %v826_v49 = vsub.f32 %v565_v14, %v812_v47 }
 0x3ff   :  { %v840_v50 = vmul.f32 1.442695, %v827_v48  ;;  %v838_v51 = vmul.f32 1.442695, %v826_v49 }
 0x400   :  { %v821_v53 = vpop.xlane.xlu1 %820  ;;  %v818_v54 = vpop.xlane.xlu0 %817 }
 0x401   :  { %2123 = vpow2.f32 %v840_v50  ;;  %v829_v56 = vsub.f32 %v793_v23, %v821_v53  ;;  %v828_v57 = vsub.f32 %v717_v19, %v818_v54 }
 0x402   :  { %2125 = vpow2.f32 %v838_v51 }
 0x403   :  { %v2120_v58 = vpop.eup %2119  ;;  %v844_v59 = vmul.f32 1.442695, %v829_v56  ;;  %v842_v60 = vmul.f32 1.442695, %v828_v57 }
 0x404   :  { %v963_v61 = vpop.permute.xlu1 %962  ;;  %v887_v62 = vpop.permute.xlu0 %886  ;;  %v855_v63 = vsel %vm797_vm3, %v2120_v58, 0.0 }
 0x405   :  { %2127 = vpow2.f32 %v844_v59  ;;  %2006 = vmatpush3.msra.mxu0 %v963_v61  ;;  %856 = vadd.xlane.f32.xlu1 %v855_v63 }
 0x406   :  { %2129 = vpow2.f32 %v842_v60  ;;  %2001 = vmatpush3.msra.mxu1 %v887_v62  ;;  %2015 = vmatprep.subr.mxu0 %v2227_v44 }
 0x407   :  { %v2122_v2 = vpop.eup %2121  ;;  %2010 = vmatprep.subr.mxu1 %v2227_v44 }
 0x408   :  { %v852_v3 = vsel %vm797_vm3, %v2122_v2, 0.0  ;;  %v1039_v14 = vpop.permute.xlu1 %1038  ;;  %v1191_v15 = vpop.permute.xlu0 %1190 }
 0x409   :  { %853 = vadd.xlane.f32.xlu0 %v852_v3 }
 0x40b   :  { %v2124_v4 = vpop.eup %2123 }
 0x40c   :  { %v2435_v5 = vpop.eup %2125  ;;  %v861_v6 = vsel %vm797_vm3, %v2124_v4, 0.0  ;;  %v1115_v16 = vpop.permute.xlu1 %1114 }
 0x40d   :  { %862 = vadd.xlane.f32.xlu1 %v861_v6  ;;  %v858_v7 = vsel %vm797_vm3, %v2435_v5, 0.0 }
 0x40e   :  { %859 = vadd.xlane.f32.xlu0 %v858_v7 }
 0x40f   :  { %v2440_v10 = vpop.eup %2127 }
 0x410   :  { %v2442_v11 = vpop.eup %2129  ;;  %v867_v12 = vsel %vm797_vm3, %v2440_v10, 0.0  ;;  %v1267_v18 = vpop.permute.xlu1 %1266 }
 0x411   :  { %868 = vadd.xlane.f32.xlu1 %v867_v12  ;;  %v864_v13 = vsel %vm797_vm3, %v2442_v11, 0.0 }
 0x412   :  { %865 = vadd.xlane.f32.xlu0 %v864_v13 }
 0x422   :  { %1418 = vrot.lane.b32.xlu1 %v2354_v55, %s2233_s9 }
 0x428   :  { %1342 = vrot.lane.b32.xlu0 %v2345_v52, %s2233_s9 }
 0x42c   :  { %2097 = vrot.lane.b32.xlu0 %v2468_v34, %s2234_s10 }
 0x439   :  { %v848_v17 = vpop.xlane.xlu0 %847 }
 0x43a   :  { %2131 = vrcp.f32 %v848_v17  ;;  %v1527_v17 = vsub.s32 5, %v2305_v25 }
 0x441   :  { %v851_v19 = vpop.xlane.xlu1 %850 }
 0x442   :  { %2133 = vrcp.f32 %v851_v19 }
 0x444   :  { %v2132_v20 = vpop.eup %2131 }
 0x445   :  { %v878_v21 = vmul.f32 %v2132_v20, %v2423_v35 }
 0x447   :  { %2003 = vmatmul.mubr.msk.f32.vlgmr.msra.gmra.mrb[8].mxu1 %vm797_vm3, %v878_v21 }
 0x448   :  { %2011 = vmatpush3.msra.mxu1 %v1039_v14  ;;  %2012 = vmatprep.mubr.msk.f32.mxu1 %vm2228_vm1, %v2227_v44 }
 0x449   :  { %2020 = vmatprep.subr.mxu1 %v2227_v44 }
 0x44c   :  { %v2134_v52 = vpop.eup %2133 }
 0x44d   :  { %v879_v55 = vmul.f32 %v2134_v52, %v2427_v37 }
 0x44f   :  { %2008 = vmatmul.mubr.msk.f32.vlgmr.msra.gmra.mrb[10].mxu0 %vm797_vm3, %v879_v55 }
 0x450   :  { %2016 = vmatpush3.msra.mxu0 %v1115_v16  ;;  %2017 = vmatprep.mubr.msk.f32.mxu0 %vm2228_vm1, %v2227_v44 }
 0x451   :  { %2025 = vmatprep.subr.mxu0 %v2227_v44 }
 0x492   :  { %v857_v22 = vpop.xlane.xlu1 %856 }
 0x493   :  { %2135 = vrcp.f32 %v857_v22 }
 0x496   :  { %v854_v23 = vpop.xlane.xlu0 %853 }
 0x497   :  { %2137 = vrcp.f32 %v854_v23 }
 0x49a   :  { %v863_v24 = vpop.xlane.xlu1 %862 }
 0x49b   :  { %2139 = vrcp.f32 %v863_v24  ;;  %v860_v26 = vpop.xlane.xlu0 %859 }
 0x49c   :  { %2141 = vrcp.f32 %v860_v26 }
 0x49d   :  { %v2136_v27 = vpop.eup %2135 }
 0x49e   :  { %v881_v29 = vmul.f32 %v2136_v27, %v2120_v58  ;;  %v869_v30 = vpop.xlane.xlu1 %868 }
 0x49f   :  { %2143 = vrcp.f32 %v869_v30  ;;  %v866_v31 = vpop.xlane.xlu0 %865 }
 0x4a0   :  { %2145 = vrcp.f32 %v866_v31  ;;  %2018 = vmatmul.mubr.msk.f32.vlgmr.msra.gmra.mrb[12].mxu0 %vm797_vm3, %v881_v29 }
 0x4a1   :  { %v2138_v32 = vpop.eup %2137  ;;  %2026 = vmatpush3.msra.mxu0 %v1267_v18  ;;  %2027 = vmatprep.mubr.msk.f32.mxu0 %vm2228_vm1, %v2227_v44  ;;  %v1528_v18 = vrot.slane %v2308_v28, %v1527_v17 }
 0x4a2   :  { %v880_v33 = vmul.f32 %v2138_v32, %v2122_v2  ;;  %2035 = vmatprep.subr.mxu0 %v2227_v44  ;;  %v1419_v39 = vpop.permute.xlu1 %1418 }
 0x4a3   :  { %v1343_v9 = vpop.permute.xlu0 %1342 }
 0x4a4   :  { %2013 = vmatmul.mubr.msk.f32.vlgmr.msra.gmra.mrb[10].mxu1 %vm797_vm3, %v880_v33 }
 0x4a5   :  { %v2140_v35 = vpop.eup %2139  ;;  %2021 = vmatpush3.msra.mxu1 %v1191_v15  ;;  %2022 = vmatprep.mubr.msk.f32.mxu1 %vm2228_vm1, %v2227_v44 }
 0x4a6   :  { %v2142_v36 = vpop.eup %2141  ;;  %v883_v37 = vmul.f32 %v2140_v35, %v2124_v4  ;;  %2030 = vmatprep.subr.mxu1 %v2227_v44 }
 0x4a7   :  { %v882_v38 = vmul.f32 %v2142_v36, %v2435_v5  ;;  %v2098_v43 = vpop.permute.xlu0 %2097 }
 0x4a8   :  { %2028 = vmatmul.mubr.msk.f32.vlgmr.msra.gmra.mrb[14].mxu0 %vm797_vm3, %v883_v37  ;;  %v2100_v45 = vunpack.i.h.bf16 %v2098_v43  ;;  %v2099_v46 = vunpack.i.l.bf16 %v2098_v43 }
 0x4a9   :  { %v2144_v8 = vpop.eup %2143  ;;  %2023 = vmatmul.mubr.msk.f32.vlgmr.msra.gmra.mrb[12].mxu1 %vm797_vm3, %v882_v38  ;;  %2036 = vmatpush3.msra.mxu0 %v1419_v39 }
 0x4aa   :  { %v2146_v40 = vpop.eup %2145  ;;  %v885_v41 = vmul.f32 %v2144_v8, %v2440_v10  ;;  %2031 = vmatpush3.msra.mxu1 %v1343_v9  ;;  %2032 = vmatprep.mubr.msk.f32.mxu1 %vm2228_vm1, %v2227_v44  ;;  %v2065_v49 = vpack.c.bf16 %v2100_v45, %v2099_v46  ;;  %v1652_v46 = vsub.s32 2, %v2305_v25 }
 0x4ab   :  { %v884_v42 = vmul.f32 %v2146_v40, %v2442_v11  ;;  %2037 = vmatprep.mubr.msk.f32.mxu0 %vm2228_vm1, %v2227_v44 }
 0x4ac   :  { %2038 = vmatmul.mubr.msk.f32.vlgmr.msra.gmra.mrb[16].mxu0 %vm797_vm3, %v885_v41  ;;  %2066 = vmatprep.subr.bf16.mxu1 %v2065_v49 }
 0x4ad   :  { %2033 = vmatmul.mubr.msk.f32.vlgmr.msra.gmra.mrb[14].mxu1 %vm797_vm3, %v884_v42 }
 0x4ae   :  { %2068 = vmatpush3.bf16.msra.mxu1 %v2065_v49  ;;  %v1653_v49 = vrot.slane %v2308_v28, %v1652_v46 }
 0x51a   :  { %v958_v47 = vpop.f32.mrb[8].mxu1 }
 0x51b   :  { %v2004_v48 = vpop.f32.mrb[9].mxu1 }
 0x522   :  { %v1034_v50 = vpop.f32.mrb[10].mxu0 }
 0x523   :  { %v2009_v51 = vpop.f32.mrb[11].mxu0 }
 0x573   :  { %v1186_v53 = vpop.f32.mrb[12].mxu0 }
 0x574   :  { %v2019_v54 = vpop.f32.mrb[13].mxu0  ;;  %1498 = vrot.lane.b32.xlu0 %v1186_v53, %s2235_s11 }
 0x577   :  { %v1110_v56 = vpop.f32.mrb[10].mxu1 }
 0x578   :  { %1496 = vrot.lane.b32.xlu1 %v1110_v56, %s2235_s11  ;;  %v2014_v44 = vpop.f32.mrb[11].mxu1 }
 0x57b   :  { %v1338_v57 = vpop.f32.mrb[14].mxu0 }
 0x57c   :  { %v1262_v58 = vpop.f32.mrb[12].mxu1  ;;  %v2029_v59 = vpop.f32.mrb[15].mxu0  ;;  %1506 = vrot.lane.b32.xlu0 %v1338_v57, %s2225_s20 }
 0x57d   :  { %1504 = vrot.lane.b32.xlu1 %v1262_v58, %s2225_s20  ;;  %v2024_v60 = vpop.f32.mrb[13].mxu1 }
 0x57f   :  { %v1490_v61 = vpop.f32.mrb[16].mxu0 }
 0x580   :  { %v1414_v62 = vpop.f32.mrb[14].mxu1  ;;  %v2039_v63 = vpop.f32.mrb[17].mxu0  ;;  %1514 = vrot.lane.b32.xlu0 %v1490_v61, %s2236_s12 }
 0x581   :  { %1512 = vrot.lane.b32.xlu1 %v1414_v62, %s2236_s12  ;;  %v2034_v2 = vpop.f32.mrb[15].mxu1 }
 0x5e6   :  { %v1499_v3 = vpop.permute.xlu0 %1498 }
 0x5e7   :  { %v1519_v7 = vsel %vm190_vm2, %v1034_v50, %v1499_v3  ;;  %v1664_v3 = vsub.s32 6, %v2305_v25 }
 0x5ea   :  { %v1497_v4 = vpop.permute.xlu1 %1496 }
 0x5eb   :  { %v1518_v10 = vsel %vm190_vm2, %v958_v47, %v1497_v4  ;;  %v1658_v47 = vsub.s32 3, %v2305_v25  ;;  %v1665_v4 = vrot.slane %v2308_v28, %v1664_v3 }
 0x5ed   :  { %v1659_v44 = vrot.slane %v2308_v28, %v1658_v47 }
 0x5ee   :  { %v1507_v5 = vpop.permute.xlu0 %1506 }
 0x5ef   :  { %v1505_v6 = vpop.permute.xlu1 %1504  ;;  %v1521_v11 = vsel %vm797_vm3, %v1519_v7, %v1507_v5 }
 0x5f0   :  { %v1520_v13 = vsel %vm797_vm3, %v1518_v10, %v1505_v6 }
 0x5f2   :  { %v1515_v12 = vpop.permute.xlu0 %1514 }
 0x5f3   :  { %v1513_v14 = vpop.permute.xlu1 %1512  ;;  %v1524_v15 = vsel %vm1522_vm4, %v1521_v11, %v1515_v12 }
 0x5f4   :  { %v1523_v16 = vsel %vm1522_vm4, %v1520_v13, %v1513_v14  ;;  %v1757_v13 = vsub.s32 7, %v2305_v25 }
 0x5f5   :  { %2044 = vmatprep.mubr.msk.f32.mxu1 %vm45_vm0, %v1523_v16 }
 0x5f6   :  { %2045 = vmatmul.mubr.msk.f32.vlgmr.msra.gmra.mrb[16].mxu1 %vm45_vm0, %v1524_v15  ;;  %v1758_v14 = vrot.slane %v2308_v28, %v1757_v13 }
 0x6c9   :  { %v2046_v19 = vpop.f32.mrb[16].mxu1 }
 0x6ca   :  { %v1615_v20 = vadd.f32 %v2046_v19, %v1528_v18  ;;  %v1609_v21 = vpop.f32.mrb[17].mxu1 }
 0x6cb   :  { %v1610_v52 = vadd.f32 %v1609_v21, %v1528_v18 }
 0x6cc   :  { %v2497_v55 = vadd.f32 %v1615_v20, %v2287_v1 }
 0x6cd   :  { %v2500_v22 = vadd.f32 %v1610_v52, %v2285_v0 }
 0x6ce   :  { %v1623_v23 = vsel %vm45_vm0, %v2497_v55, 0.0  ;;  %v1629_v1 = vmul.f32 %v2497_v55, %v2497_v55 }
 0x6cf   :  { %1624 = vadd.xlane.f32.xlu0 %v1623_v23  ;;  %v1620_v24 = vsel %vm45_vm0, %v2500_v22, 0.0  ;;  %v1628_v26 = vmul.f32 %v2500_v22, %v2500_v22 }
 0x6d0   :  { %1621 = vadd.xlane.f32.xlu1 %v1620_v24  ;;  %v1633_v0 = vsel %vm45_vm0, %v1629_v1, 0.0 }
 0x6d1   :  { %v1630_v27 = vsel %vm45_vm0, %v1628_v26, 0.0 }
 0x6d3   :  { %1631 = vadd.xlane.f32.xlu0 %v1630_v27 }
 0x6d7   :  { %1634 = vadd.xlane.f32.xlu0 %v1633_v0 }
 0x6e1   :  { %2102 = vrot.lane.b32.xlu1 %v2468_v34, %s2237_s13 }
 0x6ed   :  { %2107 = vrot.lane.b32.xlu0 %v2468_v34, %s2238_s14 }
 0x75c   :  { %v1625_v29 = vpop.xlane.xlu0 %1624 }
 0x75d   :  { %v1622_v30 = vpop.xlane.xlu1 %1621  ;;  %v1627_v35 = vmul.f32 0.0625, %v1625_v29 }
 0x75e   :  { %v1626_v31 = vmul.f32 0.0625, %v1622_v30 }
 0x75f   :  { %v1639_v41 = vmul.f32 %v1627_v35, %v1627_v35  ;;  %v1643_v58 = vsub.f32 %v2497_v55, %v1627_v35 }
 0x760   :  { %v1638_v32 = vmul.f32 %v1626_v31, %v1626_v31  ;;  %v1632_v33 = vpop.xlane.xlu0 %1631  ;;  %v1642_v48 = vsub.f32 %v2500_v22, %v1626_v31 }
 0x761   :  { %v1636_v36 = vmul.f32 0.0625, %v1632_v33  ;;  %v2103_v37 = vpop.permute.xlu1 %2102 }
 0x762   :  { %v2105_v38 = vunpack.i.h.bf16 %v2103_v37  ;;  %v2104_v39 = vunpack.i.l.bf16 %v2103_v37 }
 0x763   :  { %v1640_v8 = vsub.f32 %v1636_v36, %v1638_v32 }
 0x764   :  { %v1635_v9 = vpop.xlane.xlu0 %1634  ;;  %v2069_v40 = vpack.c.bf16 %v2105_v38, %v2104_v39 }
 0x765   :  { %v1644_v42 = vadd.f32 1e-05, %v1640_v8  ;;  %v1637_v43 = vmul.f32 0.0625, %v1635_v9 }
 0x766   :  { %2070 = vmatprep.subr.bf16.mxu0 %v2069_v40 }
 0x767   :  { %2147 = vrsqrt.f32 %v1644_v42  ;;  %v1641_v45 = vsub.f32 %v1637_v43, %v1639_v41  ;;  %2072 = vmatpush3.bf16.msra.mxu0 %v2069_v40 }
 0x768   :  { %v2108_v50 = vpop.permute.xlu0 %2107 }
 0x769   :  { %v1645_v34 = vadd.f32 1e-05, %v1641_v45  ;;  %v2110_v53 = vunpack.i.h.bf16 %v2108_v50  ;;  %v2109_v54 = vunpack.i.l.bf16 %v2108_v50 }
 0x76b   :  { %2149 = vrsqrt.f32 %v1645_v34  ;;  %v2073_v57 = vpack.c.bf16 %v2110_v53, %v2109_v54 }
 0x76d   :  { %2075 = vmatprep.subr.msk.bf16.mxu1 %vm2074_vm6, %v2073_v57 }
 0x76e   :  { %2078 = vmatpush3.bf16.xpose.msk.msra.mxu1 %vm2074_vm6, %v2073_v57 }
 0x771   :  { %v2148_v51 = vpop.eup %2147 }
 0x772   :  { %v1648_v56 = vmul.f32 %v2148_v51, %v1642_v48 }
 0x774   :  { %v1654_v59 = vmul.f32 %v1653_v49, %v1648_v56 }
 0x775   :  { %v2150_v60 = vpop.eup %2149 }
 0x776   :  { %v1649_v61 = vmul.f32 %v2150_v60, %v1643_v58  ;;  %v1660_v62 = vadd.f32 %v1659_v44, %v1654_v59 }
 0x778   :  { %v1655_v63 = vmul.f32 %v1653_v49, %v1649_v61  ;;  %2051 = vmatprep.mubr.msk.f32.mxu0 %vm45_vm0, %v1660_v62 }
 0x77a   :  { %v1661_v2 = vadd.f32 %v1659_v44, %v1655_v63 }
 0x77c   :  { %2052 = vmatmul.mubr.msk.f32.vlgmr.msra.gmra.mrb[18].mxu0 %vm45_vm0, %v1661_v2 }
 0x84f   :  { %v2053_v5 = vpop.f32.mrb[18].mxu0 }
 0x850   :  { %v1750_v6 = vadd.f32 %v2053_v5, %v1665_v4  ;;  %v1744_v7 = vpop.f32.mrb[19].mxu0 }
 0x851   :  { %v1745_v10 = vadd.f32 %v1744_v7, %v1665_v4 }
 0x852   :  { %v1754_v12 = vmax.f32 %v1750_v6, 0.0 }
 0x853   :  { %v1753_v11 = vmax.f32 %v1745_v10, 0.0 }
 0x855   :  { %2058 = vmatprep.mubr.msk.f32.mxu1 %vm1763_vm5, %v1753_v11 }
 0x856   :  { %2059 = vmatmul.mubr.msk.f32.vlgmr.msra.gmra.mrb[18].mxu1 %vm1763_vm5, %v1754_v12 }
 0x929   :  { %v2060_v15 = vpop.f32.mrb[18].mxu1 }
 0x92a   :  { %v1846_v16 = vadd.f32 %v2060_v15, %v1758_v14  ;;  %v1840_v17 = vpop.f32.mrb[19].mxu1 }
 0x92b   :  { %v1841_v18 = vadd.f32 %v1840_v17, %v1758_v14 }
 0x92c   :  { %v1850_v19 = vadd.f32 %v1846_v16, %v2497_v55 }
 0x92d   :  { %v1849_v20 = vadd.f32 %v1841_v18, %v2500_v22 }
 0x92e   :  { %1852 = vst.msk [vmem:[#allocation7 + $0x8] sm:$0xff] %vm45_vm0, %v1850_v19 }
 0x92f   :  { %1851 = vst.msk [vmem:[#allocation7] sm:$0xff] %vm45_vm0, %v1849_v20 }
 0x930   :  { %2206 = shalt.err (!%p2203_p6)
}
 0x931   :  { %s2207_s22 = scalar_lea.hbm %s2551_s2, 256 }
 0x932   :  { %p2208_p7 = scmp.ne.s32.totalorder %s2551_s2, %s2207_s22  ;;  %p2211_p8 = scmp.lt.u32.totalorder %s2207_s22, %s2551_s2 }
 0x934   :  { %p2213_p9 = pnand %p2211_p8, %p2208_p7 }
 0x936   :  { %2216 = shalt.err (!%p2213_p9)
}
 0x937   :  { %1864 = dma.vmem_to_hbm [thread:$0]  %s1859_s16, 256, %s2551_s2, [#allocation4], %s2224_s19, %s2224_s19, %s2225_s20  }
 0x938   :  { %2221 = dma.done.wait [#allocation4], 256  }
 0x939   :  { %2222 = vsyncadd [#allocation4], 4294967040 }
 0x93a   :  { %1868 = vsyncpa [#allocation3], 1 }
 0x93b   :  { %1869 = vsyncpa [#allocation6], 1 }
 0x93c   :  { %1870 = vsyncpa [#allocation4], 1 }

</bundles_post_ra>
